<compile_context>
chip_gen: v6e
topology: v6e:2x2x1
jax: 0.10.0
libtpu: 0.0.40
codegen_flags: <defaults>
</compile_context>

<pallas_src>
import functools

import jax
import jax.numpy as jnp
from jax.experimental import pallas as pl
from jax.experimental.pallas import tpu as pltpu

_LANES = 128
_VMEM_PHYS_BUDGET = 48 * 1024 * 1024   # stay well under v7x's 64 MiB physical VMEM


def _round_up(n, m):
    return ((n + m - 1) // m) * m


def _fused_mlp_kernel(*refs, num_layers):
    # refs = (x_ref, w0_ref, b0_ref, w1_ref, b1_ref, ..., o_ref)
    x_ref = refs[0]
    o_ref = refs[-1]
    wb = refs[1:-1]

    h = x_ref[...].astype(jnp.float32)
    for i in range(num_layers):
        w_ref = wb[2 * i]                      # [in_p, out_p], f32 or bf16
        b = wb[2 * i + 1][...]                 # [1, out_p], f32
        lhs = h.astype(w_ref.dtype)            # bf16 cast only on the bf16 path
        h = jnp.dot(lhs, w_ref[...], preferred_element_type=jnp.float32) + b
        if i < num_layers - 1:
            h = jnp.tanh(h)                    # f32 elementwise (v5e has no bf16 VPU/EUP)
    o_ref[...] = h.astype(o_ref.dtype)


def init_mlp_params(key, sizes, bias=True):
    """PyTorch-layout params: weight [out, in], bias [out], uniform(-1/sqrt(in), 1/sqrt(in))."""
    params = []
    for i in range(len(sizes) - 1):
        fan_in, fan_out = sizes[i], sizes[i + 1]
        key, wk, bk = jax.random.split(key, 3)
        bound = 1.0 / jnp.sqrt(float(fan_in))
        w = jax.random.uniform(wk, (fan_out, fan_in), jnp.float32, -bound, bound)
        if bias:
            b = jax.random.uniform(bk, (fan_out,), jnp.float32, -bound, bound)
        else:
            b = jnp.zeros((fan_out,), jnp.float32)
        params.append((w, b))
    return params


def prepare_params(params, *, use_bf16=True, lane_pad=_LANES):
    """One-time conversion to kernel layout.

    Layer i weight [out, in] -> transposed [in_p, out_p], zero-padded so every
    dim (including layer-0 input and the final output) is a multiple of
    `lane_pad` lanes.  Biases -> [1, out_p], zero-padded, kept in f32.
    Zero padding keeps padded lanes exactly 0 through tanh (tanh(0)=0).
    Use lane_pad=256 for real-sized layers on v6e/v7x (256x256 MXU).
    """
    w_dtype = jnp.bfloat16 if use_bf16 else jnp.float32
    prepared = []
    for w, b in params:
        out_dim, in_dim = w.shape
        in_p = _round_up(in_dim, lane_pad)
        out_p = _round_up(out_dim, lane_pad)
        w_t = jnp.zeros((in_p, out_p), jnp.float32).at[:in_dim, :out_dim].set(w.T)
        b_p = jnp.zeros((1, out_p), jnp.float32).at[0, :out_dim].set(b)
        prepared.append((w_t.astype(w_dtype), b_p))
    return prepared


def _pick_batch_tile(padded_batch, in_p, out_p, resident_bytes, max_dim,
                     io_itemsize, f32_chain):
    """Largest VMEM-fitting batch tile; keep >=2 grid steps when batch allows (v7x)."""
    cap = 256 if f32_chain else 1024   # f32 activation chain spills vregs above ~256 rows
    candidates = [c for c in (1024, 512, 256, 128, 64, 32, 16, 8)
                  if c <= cap and c <= padded_batch and padded_batch % c == 0]
    if not candidates:
        candidates = [padded_batch]

    def need(tb):
        io = 2 * tb * (in_p + out_p) * io_itemsize   # double-buffered x / out blocks
        act = 4 * tb * max_dim * 4                   # live f32 intermediates headroom
        return io + act + resident_bytes             # weights/biases single-buffered

    fitting = [c for c in candidates if need(c) <= _VMEM_PHYS_BUDGET]
    if not fitting:
        fitting = [candidates[-1]]
    multi = [c for c in fitting if padded_batch // c >= 2]   # both v7x TCs get work
    tb = multi[0] if multi else fitting[0]
    return tb, need(tb)


@functools.partial(jax.jit, static_argnames=("out_dim",))
def fused_mlp(x, prepared, *, out_dim):
    """Forward pass: Linear -> Tanh -> ... -> Linear, fused in one pallas_call."""
    batch, in_dim = x.shape
    num_layers = len(prepared)
    in_p = prepared[0][0].shape[0]
    out_p = prepared[-1][0].shape[1]
    assert in_dim <= in_p and out_dim <= out_p

    resident_bytes = sum(int(w.size) * w.dtype.itemsize + int(b.size) * b.dtype.itemsize
                         for w, b in prepared)
    max_dim = max(max(w.shape) for w, _ in prepared)
    f32_chain = prepared[0][0].dtype == jnp.float32

    padded_batch = _round_up(batch, 8)
    tb, need_bytes = _pick_batch_tile(padded_batch, in_p, out_p, resident_bytes,
                                      max_dim, x.dtype.itemsize, f32_chain)
    grid = (padded_batch // tb,)

    # Lane-dense, 8-row-aligned input: pad features to in_p, rows to padded_batch.
    x_p = jnp.pad(x, ((0, padded_batch - batch), (0, in_p - in_dim)))

    in_specs = [pl.BlockSpec((tb, in_p), lambda i: (i, 0))]
    flat_args = [x_p]
    for w, b in prepared:
        # Resident across all batch tiles; constant index_map -> single buffer.
        in_specs.append(pl.BlockSpec(w.shape, lambda i: (0, 0),
                                     pipeline_mode=pl.Buffered(1)))
        in_specs.append(pl.BlockSpec(b.shape, lambda i: (0, 0),
                                     pipeline_mode=pl.Buffered(1)))
        flat_args.append(w)
        flat_args.append(b)

    vmem_limit = int(min(64 * 1024 * 1024, max(2 * need_bytes, 32 * 1024 * 1024)))

    kernel = functools.partial(_fused_mlp_kernel, num_layers=num_layers)
    out = pl.pallas_call(
        kernel,
        out_shape=jax.ShapeDtypeStruct((padded_batch, out_p), x.dtype),
        grid=grid,
        in_specs=in_specs,
        out_specs=pl.BlockSpec((tb, out_p), lambda i: (i, 0)),
        compiler_params=pltpu.CompilerParams(
            dimension_semantics=("parallel",),
            vmem_limit_bytes=vmem_limit,
        ),
    )(*flat_args)
    return out[:batch, :out_dim]


def mlp_reference(x, params):
    """Pure-JAX reference matching PyTorch float32 semantics (original layout)."""
    n = len(params)
    h = x
    for i, (w, b) in enumerate(params):
        h = h @ w.T + b
        if i < n - 1:
            h = jnp.tanh(h)
    return h


if __name__ == "__main__":
    sizes = (32, 64, 48, 16)   # MLP(sizes): 3 Linear layers, Tanh after the first two
    batch = 8

    key = jax.random.PRNGKey(0)
    key, xk = jax.random.split(key)
    x = jax.random.normal(xk, (batch, sizes[0]), jnp.float32)

    params = init_mlp_params(key, sizes, bias=True)
    ref = mlp_reference(x, params)

    # bf16 MXU operand path (default, fastest on v6e/v7x) -> loose tolerance.
    prepared_bf16 = prepare_params(params, use_bf16=True)
    out_bf16 = jax.block_until_ready(fused_mlp(x, prepared_bf16, out_dim=sizes[-1]))
    assert out_bf16.shape == (batch, sizes[-1])
    assert jnp.allclose(out_bf16, ref, atol=5e-2, rtol=5e-2), "bf16 path mismatch"

    # Exact f32 operand path matches the PyTorch float32 semantics tightly.
    prepared_f32 = prepare_params(params, use_bf16=False)
    out_f32 = jax.block_until_ready(fused_mlp(x, prepared_f32, out_dim=sizes[-1]))
    assert out_f32.shape == (batch, sizes[-1])
    assert jnp.allclose(out_f32, ref, atol=1e-5, rtol=1e-5), "f32 path mismatch"

    print("KERNEL_OK")
</pallas_src>

<mosaic_0001>
module attributes {stable_mosaic.version = 11 : i64} {
  func.func @_fused_mlp_kernel(%arg0: i32, %arg1: memref<8x128xf32, #tpu.memory_space<vmem>>, %arg2: memref<128x128xbf16, #tpu.memory_space<vmem>>, %arg3: memref<1x128xf32, #tpu.memory_space<vmem>>, %arg4: memref<128x128xbf16, #tpu.memory_space<vmem>>, %arg5: memref<1x128xf32, #tpu.memory_space<vmem>>, %arg6: memref<128x128xbf16, #tpu.memory_space<vmem>>, %arg7: memref<1x128xf32, #tpu.memory_space<vmem>>, %arg8: memref<8x128xf32, #tpu.memory_space<vmem>>) attributes {dimension_semantics = [#tpu.dimension_semantics<parallel>], iteration_bounds = array<i64: 1>, scalar_prefetch = 0 : i64, scratch_operands = 0 : i64, tpu.core_type = #tpu.core_type<tc>, window_params = [{transform_indices = @transform_0, window_bounds = array<i64: 8, 128>}, {pipeline_mode = #tpu.pipeline_mode<synchronous>, transform_indices = @transform_1, window_bounds = array<i64: 128, 128>}, {pipeline_mode = #tpu.pipeline_mode<synchronous>, transform_indices = @transform_2, window_bounds = array<i64: 1, 128>}, {pipeline_mode = #tpu.pipeline_mode<synchronous>, transform_indices = @transform_3, window_bounds = array<i64: 128, 128>}, {pipeline_mode = #tpu.pipeline_mode<synchronous>, transform_indices = @transform_4, window_bounds = array<i64: 1, 128>}, {pipeline_mode = #tpu.pipeline_mode<synchronous>, transform_indices = @transform_5, window_bounds = array<i64: 128, 128>}, {pipeline_mode = #tpu.pipeline_mode<synchronous>, transform_indices = @transform_6, window_bounds = array<i64: 1, 128>}, {transform_indices = @transform_7, window_bounds = array<i64: 8, 128>}]} {
    %c0 = arith.constant 0 : index
    %c0_0 = arith.constant 0 : index
    %0 = vector.load %arg1[%c0, %c0_0] : memref<8x128xf32, #tpu.memory_space<vmem>>, vector<8x128xf32>
    %c0_1 = arith.constant 0 : index
    %c0_2 = arith.constant 0 : index
    %1 = vector.load %arg3[%c0_1, %c0_2] : memref<1x128xf32, #tpu.memory_space<vmem>>, vector<1x128xf32>
    %2 = arith.truncf %0 : vector<8x128xf32> to vector<8x128xbf16>
    %c0_3 = arith.constant 0 : index
    %c0_4 = arith.constant 0 : index
    %3 = vector.load %arg2[%c0_3, %c0_4] : memref<128x128xbf16, #tpu.memory_space<vmem>>, vector<128x128xbf16>
    %cst = arith.constant dense<0.000000e+00> : vector<8x128xf32>
    %4 = tpu.matmul %2, %3, %cst {dimension_numbers = #tpu.dot_dimension_numbers<[1], [0], [0], [1], [0, 0, 1, 1], [], []>} : vector<8x128xbf16>, vector<128x128xbf16>, vector<8x128xf32> -> vector<8x128xf32>
    %5 = vector.broadcast %1 : vector<1x128xf32> to vector<8x128xf32>
    %6 = arith.addf %4, %5 : vector<8x128xf32>
    %7 = math.tanh %6 : vector<8x128xf32>
    %c0_5 = arith.constant 0 : index
    %c0_6 = arith.constant 0 : index
    %8 = vector.load %arg5[%c0_5, %c0_6] : memref<1x128xf32, #tpu.memory_space<vmem>>, vector<1x128xf32>
    %9 = arith.truncf %7 : vector<8x128xf32> to vector<8x128xbf16>
    %c0_7 = arith.constant 0 : index
    %c0_8 = arith.constant 0 : index
    %10 = vector.load %arg4[%c0_7, %c0_8] : memref<128x128xbf16, #tpu.memory_space<vmem>>, vector<128x128xbf16>
    %cst_9 = arith.constant dense<0.000000e+00> : vector<8x128xf32>
    %11 = tpu.matmul %9, %10, %cst_9 {dimension_numbers = #tpu.dot_dimension_numbers<[1], [0], [0], [1], [0, 0, 1, 1], [], []>} : vector<8x128xbf16>, vector<128x128xbf16>, vector<8x128xf32> -> vector<8x128xf32>
    %12 = vector.broadcast %8 : vector<1x128xf32> to vector<8x128xf32>
    %13 = arith.addf %11, %12 : vector<8x128xf32>
    %14 = math.tanh %13 : vector<8x128xf32>
    %c0_10 = arith.constant 0 : index
    %c0_11 = arith.constant 0 : index
    %15 = vector.load %arg7[%c0_10, %c0_11] : memref<1x128xf32, #tpu.memory_space<vmem>>, vector<1x128xf32>
    %16 = arith.truncf %14 : vector<8x128xf32> to vector<8x128xbf16>
    %c0_12 = arith.constant 0 : index
    %c0_13 = arith.constant 0 : index
    %17 = vector.load %arg6[%c0_12, %c0_13] : memref<128x128xbf16, #tpu.memory_space<vmem>>, vector<128x128xbf16>
    %cst_14 = arith.constant dense<0.000000e+00> : vector<8x128xf32>
    %18 = tpu.matmul %16, %17, %cst_14 {dimension_numbers = #tpu.dot_dimension_numbers<[1], [0], [0], [1], [0, 0, 1, 1], [], []>} : vector<8x128xbf16>, vector<128x128xbf16>, vector<8x128xf32> -> vector<8x128xf32>
    %19 = vector.broadcast %15 : vector<1x128xf32> to vector<8x128xf32>
    %20 = arith.addf %18, %19 : vector<8x128xf32>
    %c0_15 = arith.constant 0 : index
    %c0_16 = arith.constant 0 : index
    %21 = vector.load %arg8[%c0_15, %c0_16] : memref<8x128xf32, #tpu.memory_space<vmem>>, vector<8x128xf32>
    tpu.vector_store %arg8[%c0_15, %c0_16], %20 {strides = array<i32>} : memref<8x128xf32, #tpu.memory_space<vmem>>, vector<8x128xf32>,
    return
  }
  func.func @transform_0(%arg0: i32) -> (i32, i32) {
    %c0_i32 = arith.constant 0 : i32
    %c0_i32_0 = arith.constant 0 : i32
    return %arg0, %c0_i32 : i32, i32
  }
  func.func @transform_1(%arg0: i32) -> (i32, i32) {
    %c0_i32 = arith.constant 0 : i32
    %c0_i32_0 = arith.constant 0 : i32
    %c0_i32_1 = arith.constant 0 : i32
    return %c0_i32, %c0_i32_0 : i32, i32
  }
  func.func @transform_2(%arg0: i32) -> (i32, i32) {
    %c0_i32 = arith.constant 0 : i32
    %c0_i32_0 = arith.constant 0 : i32
    %c0_i32_1 = arith.constant 0 : i32
    return %c0_i32, %c0_i32_0 : i32, i32
  }
  func.func @transform_3(%arg0: i32) -> (i32, i32) {
    %c0_i32 = arith.constant 0 : i32
    %c0_i32_0 = arith.constant 0 : i32
    %c0_i32_1 = arith.constant 0 : i32
    return %c0_i32, %c0_i32_0 : i32, i32
  }
  func.func @transform_4(%arg0: i32) -> (i32, i32) {
    %c0_i32 = arith.constant 0 : i32
    %c0_i32_0 = arith.constant 0 : i32
    %c0_i32_1 = arith.constant 0 : i32
    return %c0_i32, %c0_i32_0 : i32, i32
  }
  func.func @transform_5(%arg0: i32) -> (i32, i32) {
    %c0_i32 = arith.constant 0 : i32
    %c0_i32_0 = arith.constant 0 : i32
    %c0_i32_1 = arith.constant 0 : i32
    return %c0_i32, %c0_i32_0 : i32, i32
  }
  func.func @transform_6(%arg0: i32) -> (i32, i32) {
    %c0_i32 = arith.constant 0 : i32
    %c0_i32_0 = arith.constant 0 : i32
    %c0_i32_1 = arith.constant 0 : i32
    return %c0_i32, %c0_i32_0 : i32, i32
  }
  func.func @transform_7(%arg0: i32) -> (i32, i32) {
    %c0_i32 = arith.constant 0 : i32
    %c0_i32_0 = arith.constant 0 : i32
    return %arg0, %c0_i32 : i32, i32
  }
}

</mosaic_0001>

<bundles_post_ra>
// kernel: fused_mlp.1
= control target key start
LH: loop header
LB: loop body
LE: loop exit
PB: predicated region body
PF: predicated region fallthrough
CT: control target
= control target key end

     0   :  { %12 = vsyncpa [#allocation3], 0  ;;  %s763_s0 = inlined_call_operand.vmem [shape: f32[8,128], index: 0, kind: input, shape index: {}]   ;;  %s764_s1 = inlined_call_operand.hbm [shape: bf16[128,128], index: 1, kind: input, shape index: {}]   ;;  %s765_s2 = inlined_call_operand.vmem [shape: f32[1,128], index: 2, kind: input, shape index: {}]   ;;  %s766_s3 = inlined_call_operand.hbm [shape: bf16[128,128], index: 3, kind: input, shape index: {}]   ;;  %s767_s4 = inlined_call_operand.vmem [shape: f32[1,128], index: 4, kind: input, shape index: {}]   ;;  %s768_s5 = inlined_call_operand.hbm [shape: bf16[128,128], index: 5, kind: input, shape index: {}]   ;;  %s769_s6 = inlined_call_operand.vmem [shape: f32[1,128], index: 6, kind: input, shape index: {}]   ;;  %s770_s7 = inlined_call_operand.hbm [shape: f32[8,128], index: 7, kind: output, shape index: {}]  }
   0x1   :  { %13 = vsyncpa [#allocation6], 0 }
   0x2   :  { %14 = vsyncpa [#allocation4], 0  ;;  %s661_s24 = smov [#allocation5]   ;;  %s662_s26 = smov [#allocation2]  }
   0x3   :  { %s36_s25 = sshll.u32 %s661_s24, 4  ;;  %s22_s27 = sshll.u32 %s662_s26, 4  ;;  %s37_s25 = int_to_ptr.vmem [resolvable:$true] %s36_s25  ;;  %s23_s27 = int_to_ptr.vmem [resolvable:$true] %s22_s27 }
   0x4   :  { %s583_s28 = scalar_lea.vmem %s37_s25, 1024  ;;  %p588_p1 = scmp.lt.s32.totalorder %s37_s25, %s37_s25 }
   0x5   :  { %p584_p0 = scmp.ne.s32.totalorder %s37_s25, %s583_s28  ;;  %p589_p2 = scmp.lt.s32.totalorder %s583_s28, %s583_s28 }
   0x7   :  { %p590_p3 = por %p589_p2, %p588_p1 }
   0x9   :  { %p591_p4 = pnand %p590_p3, %p584_p0 }
   0xb   :  { %594 = shalt.err (!%p591_p4)
}
   0xc   :  { %s663_s29 = smov 64   ;;  %s664_s30 = smov 4  }
   0xd   :  { %42 = dma.hbm_to_vmem [thread:$0]  %s766_s3, 1024, %s37_s25, [#allocation6], %s663_s29, %s663_s29, %s664_s30  }
   0xe   :  { %s603_s10 = scalar_lea.vmem %s23_s27, 1024  ;;  %p608_p6 = scmp.lt.s32.totalorder %s23_s27, %s23_s27 }
   0xf   :  { %p604_p5 = scmp.ne.s32.totalorder %s23_s27, %s603_s10  ;;  %p609_p7 = scmp.lt.s32.totalorder %s603_s10, %s603_s10 }
  0x11   :  { %p610_p8 = por %p609_p7, %p608_p6 }
  0x13   :  { %p611_p9 = pnand %p610_p8, %p604_p5 }
  0x15   :  { %614 = shalt.err (!%p611_p9)
}
  0x16   :  { %28 = dma.hbm_to_vmem [thread:$0]  %s764_s1, 1024, %s23_s27, [#allocation3], %s663_s29, %s663_s29, %s664_s30  }
  0x17   :  { %s665_s13 = smov [#allocation7]  }
  0x18   :  { %s50_s14 = sshll.u32 %s665_s13, 4  ;;  %s51_s14 = int_to_ptr.vmem [resolvable:$true] %s50_s14 }
  0x19   :  { %s623_s15 = scalar_lea.vmem %s51_s14, 1024  ;;  %p628_p11 = scmp.lt.s32.totalorder %s51_s14, %s51_s14 }
  0x1a   :  { %p624_p10 = scmp.ne.s32.totalorder %s51_s14, %s623_s15  ;;  %p629_p12 = scmp.lt.s32.totalorder %s623_s15, %s623_s15 }
  0x1c   :  { %p630_p13 = por %p629_p12, %p628_p11 }
  0x1e   :  { %p631_p0 = pnand %p630_p13, %p624_p10 }
  0x20   :  { %634 = shalt.err (!%p631_p0)
}
  0x21   :  { %56 = dma.hbm_to_vmem [thread:$0]  %s768_s5, 1024, %s51_s14, [#allocation6], %s663_s29, %s663_s29, %s664_s30  }
  0x22   :  { %655 = dma.done.wait [#allocation3], 1024  }
  0x23   :  { %656 = vsyncadd [#allocation3], 4294966272 }
  0x24   :  { %657 = dma.done.wait [#allocation6], 2048  }
  0x25   :  { %658 = vsyncadd [#allocation6], 4294965248  ;;  %v666_v0 = vmov 0.0   ;;  %vm667_vm0 = vmmov 0   ;;  %v547_v1 = vld [vmem:[#allocation2 + $0x38] sm:$0xff]   ;;  %v548_v2 = vld [vmem:[#allocation2 + $0x30] sm:$0xff]  }
  0x26   :  { %479 = vmatprep.subr.bf16.mxu0 %v666_v0  ;;  %495 = vmatprep.mubr.msk.bf16.mxu0 %vm667_vm0, %v666_v0  ;;  %v549_v3 = vld [vmem:[#allocation2 + $0x28] sm:$0xff]   ;;  %v555_v4 = vld [vmem:[#allocation5 + $0x38] sm:$0xff]   ;;  %v550_v5 = vld [vmem:[#allocation2 + $0x20] sm:$0xff]   ;;  %s668_s21 = smov [#allocation8]  }
  0x27   :  { %499 = vmatprep.subr.bf16.mxu1 %v666_v0  ;;  %515 = vmatprep.mubr.msk.bf16.mxu1 %vm667_vm0, %v666_v0  ;;  %v556_v6 = vld [vmem:[#allocation5 + $0x30] sm:$0xff]   ;;  %v551_v7 = vld [vmem:[#allocation2 + $0x18] sm:$0xff]   ;;  %v557_v8 = vld [vmem:[#allocation5 + $0x28] sm:$0xff]   ;;  %s415_s22 = sshll.u32 %s668_s21, 4  ;;  %s416_s22 = int_to_ptr.vmem [resolvable:$true] %s415_s22 }
  0x28   :  { %480 = vmatpush3.bf16.msra.mxu0 %v547_v1  ;;  %500 = vmatpush3.bf16.msra.mxu1 %v555_v4  ;;  %v552_v9 = vld [vmem:[#allocation2 + $0x10] sm:$0xff]   ;;  %v553_v10 = vld [vmem:[#allocation2 + $0x8] sm:$0xff]   ;;  %v554_v11 = vld [vmem:[#allocation2] sm:$0xff]   ;;  %p640_p2 = scmp.lt.s32.totalorder %s416_s22, %s416_s22 }
  0x29   :  { %481 = vmatprep.subr.bf16.mxu0 %v666_v0  ;;  %501 = vmatprep.subr.bf16.mxu1 %v666_v0  ;;  %v69_v12 = vld [vmem:[%s763_s0] sm:$0xff]  ;;  %v559_v15 = vld [vmem:[#allocation5 + $0x18] sm:$0xff]   ;;  %v560_v16 = vld [vmem:[#allocation5 + $0x10] sm:$0xff]  }
  0x2a   :  { %v71_v13 = vpack.c.bf16 %v69_v12, %v69_v12  ;;  %v558_v14 = vld [vmem:[#allocation5 + $0x20] sm:$0xff]   ;;  %v561_v17 = vld [vmem:[#allocation5 + $0x8] sm:$0xff]   ;;  %v563_v19 = vld [vmem:[#allocation7 + $0x38] sm:$0xff]  }
  0x2b   :  { %v562_v18 = vld [vmem:[#allocation5] sm:$0xff]   ;;  %v564_v20 = vld [vmem:[#allocation7 + $0x30] sm:$0xff]   ;;  %v565_v21 = vld [vmem:[#allocation7 + $0x28] sm:$0xff]  }
  0x2c   :  { %482 = vmatpush3.bf16.msra.mxu0 %v548_v2  ;;  %502 = vmatpush3.bf16.msra.mxu1 %v556_v6  ;;  %v425_v22 = vld [vmem:[%s765_s2] ss:$0 sm:$0xff]  ;;  %v567_v31 = vld [vmem:[#allocation7 + $0x18] sm:$0xff]   ;;  %v568_v32 = vld [vmem:[#allocation7 + $0x10] sm:$0xff]  }
  0x2d   :  { %483 = vmatprep.subr.bf16.mxu0 %v666_v0  ;;  %503 = vmatprep.subr.bf16.mxu1 %v666_v0  ;;  %v566_v30 = vld [vmem:[#allocation7 + $0x20] sm:$0xff]   ;;  %v569_v33 = vld [vmem:[#allocation7 + $0x8] sm:$0xff]  }
  0x2e   :  { %v570_v34 = vld [vmem:[#allocation7] sm:$0xff]  }
  0x2f   :  { %v434_v35 = vld [vmem:[%s767_s4] ss:$0 sm:$0xff]  ;;  %s635_s4 = scalar_lea.vmem %s416_s22, 128 }
  0x30   :  { %484 = vmatpush3.bf16.msra.mxu0 %v549_v3  ;;  %504 = vmatpush3.bf16.msra.mxu1 %v557_v8  ;;  %v443_v43 = vld [vmem:[%s769_s6] ss:$0 sm:$0xff]  ;;  %p636_p1 = scmp.ne.s32.totalorder %s416_s22, %s635_s4  ;;  %p641_p3 = scmp.lt.s32.totalorder %s635_s4, %s635_s4 }
  0x31   :  { %485 = vmatprep.subr.bf16.mxu0 %v666_v0  ;;  %505 = vmatprep.subr.bf16.mxu1 %v666_v0 }
  0x32   :  { %p642_p4 = por %p641_p3, %p640_p2 }
  0x34   :  { %486 = vmatpush3.bf16.msra.mxu0 %v550_v5  ;;  %506 = vmatpush3.bf16.msra.mxu1 %v558_v14  ;;  %p643_p5 = pnand %p642_p4, %p636_p1 }
  0x35   :  { %487 = vmatprep.subr.bf16.mxu0 %v666_v0  ;;  %507 = vmatprep.subr.bf16.mxu1 %v666_v0 }
  0x38   :  { %488 = vmatpush3.bf16.msra.mxu0 %v551_v7  ;;  %508 = vmatpush3.bf16.msra.mxu1 %v559_v15 }
  0x39   :  { %489 = vmatprep.subr.bf16.mxu0 %v666_v0  ;;  %509 = vmatprep.subr.bf16.mxu1 %v666_v0 }
  0x3c   :  { %490 = vmatpush3.bf16.msra.mxu0 %v552_v9  ;;  %510 = vmatpush3.bf16.msra.mxu1 %v560_v16 }
  0x3d   :  { %491 = vmatprep.subr.bf16.mxu0 %v666_v0  ;;  %511 = vmatprep.subr.bf16.mxu1 %v666_v0 }
  0x40   :  { %492 = vmatpush3.bf16.msra.mxu0 %v553_v10  ;;  %512 = vmatpush3.bf16.msra.mxu1 %v561_v17 }
  0x41   :  { %493 = vmatprep.subr.bf16.mxu0 %v666_v0  ;;  %513 = vmatprep.subr.bf16.mxu1 %v666_v0 }
  0x44   :  { %494 = vmatpush3.bf16.msra.mxu0 %v554_v11  ;;  %514 = vmatpush3.bf16.msra.mxu1 %v562_v18 }
  0x45   :  { %519 = vmatprep.subr.bf16.mxu0 %v666_v0 }
  0x47   :  { %496 = vmatmul.mubr.bf16.vlgmr.msra.gmra.mxu0 %v71_v13 }
  0x48   :  { %535 = vmatprep.mubr.msk.bf16.mxu0 %vm667_vm0, %v666_v0  ;;  %520 = vmatpush3.bf16.msra.mxu0 %v563_v19 }
  0x49   :  { %521 = vmatprep.subr.bf16.mxu0 %v666_v0 }
  0x4c   :  { %522 = vmatpush3.bf16.msra.mxu0 %v564_v20 }
  0x4d   :  { %523 = vmatprep.subr.bf16.mxu0 %v666_v0 }
  0x50   :  { %524 = vmatpush3.bf16.msra.mxu0 %v565_v21 }
  0x51   :  { %525 = vmatprep.subr.bf16.mxu0 %v666_v0 }
  0x54   :  { %526 = vmatpush3.bf16.msra.mxu0 %v566_v30 }
  0x55   :  { %527 = vmatprep.subr.bf16.mxu0 %v666_v0 }
  0x58   :  { %528 = vmatpush3.bf16.msra.mxu0 %v567_v31 }
  0x59   :  { %529 = vmatprep.subr.bf16.mxu0 %v666_v0 }
  0x5c   :  { %530 = vmatpush3.bf16.msra.mxu0 %v568_v32 }
  0x5d   :  { %531 = vmatprep.subr.bf16.mxu0 %v666_v0 }
  0x60   :  { %532 = vmatpush3.bf16.msra.mxu0 %v569_v33 }
  0x61   :  { %533 = vmatprep.subr.bf16.mxu0 %v666_v0 }
  0x64   :  { %534 = vmatpush3.bf16.msra.mxu0 %v570_v34 }
 0x107   :  { %v176_v23 = vpop.f32.mrf.mxu0 }
 0x108   :  { %v177_v24 = vadd.f32 %v425_v22, %v176_v23 }
 0x109   :  { %v497_v25 = vpop.f32.mrf.mxu0 }
 0x10a   :  { %571 = vtanh.f32 %v177_v24 }
 0x10b   :  { %v179_v26 = vpop.f32.mrf.mxu0 }
 0x10d   :  { %v498_v27 = vpop.f32.mrf.mxu0 }
 0x117   :  { %v572_v28 = vpop.eup %571 }
 0x118   :  { %v184_v29 = vpack.c.bf16 %v572_v28, %v572_v28 }
 0x11a   :  { %516 = vmatmul.mubr.bf16.vlgmr.msra.gmra.mxu1 %v184_v29 }
 0x1da   :  { %v289_v36 = vpop.f32.mrf.mxu1 }
 0x1db   :  { %v290_v37 = vadd.f32 %v434_v35, %v289_v36 }
 0x1dc   :  { %v517_v38 = vpop.f32.mrf.mxu1 }
 0x1dd   :  { %573 = vtanh.f32 %v290_v37 }
 0x1de   :  { %v292_v39 = vpop.f32.mrf.mxu1 }
 0x1e0   :  { %v518_v40 = vpop.f32.mrf.mxu1 }
 0x1ea   :  { %v574_v41 = vpop.eup %573 }
 0x1eb   :  { %v297_v42 = vpack.c.bf16 %v574_v41, %v574_v41 }
 0x1ed   :  { %536 = vmatmul.mubr.bf16.vlgmr.msra.gmra.mxu0 %v297_v42 }
 0x2ad   :  { %v402_v44 = vpop.f32.mrf.mxu0 }
 0x2ae   :  { %v403_v45 = vadd.f32 %v443_v43, %v402_v44 }
 0x2af   :  { %v537_v46 = vpop.f32.mrf.mxu0 }
 0x2b0   :  { %408 = vst [vmem:[#allocation8] sm:$0xff] %v403_v45 }
 0x2b1   :  { %v405_v47 = vpop.f32.mrf.mxu0 }
 0x2b2   :  { %646 = shalt.err (!%p643_p5)
}
 0x2b3   :  { %418 = dma.vmem_to_hbm [thread:$0]  %s416_s22, 128, %s770_s7, [#allocation4]   ;;  %v538_v48 = vpop.f32.mrf.mxu0 }
 0x2b4   :  { %659 = dma.done.wait [#allocation4], 128  }
 0x2b5   :  { %660 = vsyncadd [#allocation4], 4294967168 }
 0x2b6   :  { %422 = vsyncpa [#allocation3], 1 }
 0x2b7   :  { %423 = vsyncpa [#allocation6], 1 }
 0x2b8   :  { %424 = vsyncpa [#allocation4], 1 }

</bundles_post_ra>
